<compile_context>
chip_gen: v7x
topology: tpu7x:2x2x1
jax: 0.10.0
libtpu: 0.0.40
codegen_flags: <defaults>
</compile_context>

<pallas_src>
import jax
import jax.numpy as jnp
from jax.experimental import pallas as pl
from jax.experimental.pallas import tpu as pltpu

_RANK_PAD = 8  # rank-2 factor zero-padded to a full sublane group


def _round_up(x, m):
    return ((x + m - 1) // m) * m


def _sinc(x):
    # torch.sinc (normalized): sin(pi x) / (pi x), value 1 at x == 0.
    px = jnp.pi * x
    safe = jnp.where(px == 0.0, 1.0, px)
    return jnp.where(px == 0.0, 1.0, jnp.sin(safe) / safe)


def _vmem_capacity_bytes():
    """Per-core VMEM capacity; conservative 64 MiB (v7x) fallback."""
    try:
        info = pltpu.get_tpu_info()
        cap = getattr(info, "vmem_capacity_bytes", None)
        if cap:
            return max(int(cap), 64 * 1024 * 1024)
    except Exception:
        pass
    return 64 * 1024 * 1024


def linear_cwt_kernel(x_ref, p_ref, c_ref, bias_ref, o_ref):
    # x_ref:    (tile_m, in_f)    VMEM  — resident across the inner column-tile loop
    # p_ref:    (in_f, 8)         VMEM  — [psi*t, psi, 0...] (fetched once)
    # c_ref:    (8, tile_n)       VMEM  — [scale; -2^(-a/2)*b; 0...]
    # bias_ref: (1, tile_n)       VMEM
    # o_ref:    (tile_m, tile_n)  VMEM
    r = jnp.dot(x_ref[...], p_ref[...], preferred_element_type=jnp.float32)   # (tile_m, 8)
    y = jnp.dot(r, c_ref[...], preferred_element_type=jnp.float32)            # (tile_m, tile_n)
    o_ref[...] = (y + bias_ref[...]).astype(o_ref.dtype)


def linear_cwt(x, a, b, bias=None, *, tile_m=512, tile_n=256):
    """Pallas-backed LinearCWT.forward. x: (..., in_features) -> (..., out_features)."""
    in_f = x.shape[-1]
    out_f = a.shape[0]
    lead = x.shape[:-1]

    x2d = x.reshape(-1, in_f)
    m_orig = x2d.shape[0]
    m = max(m_orig, 1)
    x_bytes = x2d.dtype.itemsize

    # --- tile sizing -------------------------------------------------------
    # Rows: sublane-aligned (16 for packed bf16).  Columns: lane-dense multiple of 128;
    # prefer 256 (full MXU width on v6e/v7x) when it divides the padded out dim.
    row_align = 16 if x2d.dtype == jnp.bfloat16 else 8
    out_pad = _round_up(out_f, 128)
    tn = max(128, _round_up(min(tile_n, out_pad), 128))
    while out_pad % tn != 0:
        tn -= 128
    tile_n = tn

    tile_m = max(row_align, _round_up(min(tile_m, _round_up(m, row_align)), row_align))

    cap = _vmem_capacity_bytes()
    budget = int(cap * 0.70)                       # leave headroom (v7x has only 64 MiB)

    def _est(tm):
        return (2 * tm * in_f * x_bytes            # x tile, double-buffered
                + 2 * tm * tile_n * x_bytes        # out tile, double-buffered
                + 2 * _round_up(in_f, 8) * 128 * 4 # P slab (lane-padded in VMEM), 2 bufs
                + 4 * 8 * tile_n * 4)              # C + bias blocks (sublane-padded)

    while _est(tile_m) > budget and tile_m > row_align:
        tile_m = max(row_align, _round_up(tile_m // 2, row_align))

    m_pad = _round_up(m, tile_m)
    m_tiles = m_pad // tile_m
    n_tiles = out_pad // tile_n

    # --- wrapper-side precompute (hoists all transcendentals out of the kernel) --------
    if m_pad != x2d.shape[0]:
        x2d = jnp.pad(x2d, ((0, m_pad - x2d.shape[0]), (0, 0)))

    t = jnp.linspace(-1.0, 1.0, in_f, dtype=jnp.float32)        # (in_f,)
    psi = _sinc(0.5 * t) * jnp.cos(1.5 * jnp.pi * t)
    p_mat = jnp.zeros((in_f, _RANK_PAD), jnp.float32)
    p_mat = p_mat.at[:, 0].set(psi * t).at[:, 1].set(psi)
    p_mat = p_mat.astype(x2d.dtype)          # bf16 x -> bf16 P (mixed precision, f32 acc)

    af = a.reshape(out_f).astype(jnp.float32)
    bf_ = b.reshape(out_f).astype(jnp.float32)
    scale = jnp.exp2(-1.5 * af)              # rsqrt(2^a) / 2^a
    c2 = -jnp.exp2(-0.5 * af) * bf_          # -scale * 2^a * b
    c_mat = jnp.zeros((_RANK_PAD, out_pad), jnp.float32)
    c_mat = c_mat.at[0, :out_f].set(scale).at[1, :out_f].set(c2)

    if bias is None:
        bias = jnp.zeros((out_f,), jnp.float32)
    bias_row = jnp.zeros((1, out_pad), jnp.float32).at[0, :out_f].set(
        bias.reshape(out_f).astype(jnp.float32))

    # --- compiler hints ----------------------------------------------------
    vmem_limit = int(min(cap * 0.85, max(2 * _est(tile_m) + (4 << 20), 32 << 20)))
    cost = pl.CostEstimate(
        flops=2 * m_pad * _RANK_PAD * (in_f + out_pad) + m_pad * out_pad,
        transcendentals=0,                   # all hoisted to the wrapper
        bytes_accessed=int(
            m_pad * in_f * x_bytes           # x read once (resident over inner axis)
            + m_pad * out_pad * x_bytes      # y written once
            + in_f * _RANK_PAD * p_mat.dtype.itemsize
            + (_RANK_PAD + 1) * out_pad * 4),
    )

    y2d = pl.pallas_call(
        linear_cwt_kernel,
        out_shape=jax.ShapeDtypeStruct((m_pad, out_pad), x2d.dtype),
        grid=(m_tiles, n_tiles),             # rows OUTER, output columns INNER -> x resident
        in_specs=[
            pl.BlockSpec((tile_m, in_f), lambda i, j: (i, 0)),        # x: ignores inner axis
            pl.BlockSpec((in_f, _RANK_PAD), lambda i, j: (0, 0)),     # P: fetched once
            pl.BlockSpec((_RANK_PAD, tile_n), lambda i, j: (0, j)),   # C columns
            pl.BlockSpec((1, tile_n), lambda i, j: (0, j)),           # bias columns
        ],
        out_specs=pl.BlockSpec((tile_m, tile_n), lambda i, j: (i, j)),
        compiler_params=pltpu.CompilerParams(
            # No cross-iteration state in the kernel -> both axes are safely "parallel"
            # (megacore can shard either on v7x).
            dimension_semantics=("parallel", "parallel"),
            vmem_limit_bytes=vmem_limit,
        ),
        cost_estimate=cost,
    )(x2d, p_mat, c_mat, bias_row)

    return y2d[:m_orig, :out_f].reshape(lead + (out_f,))


def linear_cwt_reference(x, a, b, bias):
    """Plain-JAX reference mirroring the PyTorch forward (literal formula)."""
    in_f = x.shape[-1]
    t = jnp.linspace(-1.0, 1.0, in_f, dtype=jnp.float32).reshape(1, -1)
    psi = _sinc(0.5 * t) * jnp.cos(0.5 * 3.0 * jnp.pi * t)
    pow2a = jnp.power(2.0, a)
    w = jax.lax.rsqrt(pow2a) * psi * (t - pow2a * b) / pow2a
    return jnp.einsum("...i,oi->...o", x, w) + bias


if __name__ == "__main__":
    key = jax.random.PRNGKey(0)
    (k_x, k_bias, k_x2, k_bias2, k_a2, k_b2,
     k_x3, k_a3, k_b3, k_bias3) = jax.random.split(key, 10)

    # --- Case 1: module defaults (a=1, b=0), single-tile grid ----------------------------
    in_f1, out_f1, batch, seq = 32, 16, 2, 8
    a1 = jnp.ones((out_f1, 1), jnp.float32)        # nn.Parameter(ones)
    b1 = jnp.zeros((out_f1, 1), jnp.float32)       # nn.Parameter(zeros)
    bias1 = 0.5 * jax.random.normal(k_bias, (out_f1,), jnp.float32)
    x1 = jax.random.normal(k_x, (batch, seq, in_f1), jnp.float32)

    y1 = jax.block_until_ready(linear_cwt(x1, a1, b1, bias1))
    y1_ref = linear_cwt_reference(x1, a1, b1, bias1)
    assert y1.shape == (batch, seq, out_f1), y1.shape
    assert jnp.allclose(y1, y1_ref, atol=1e-4, rtol=1e-4), "case 1 mismatch vs reference"

    # --- Case 2: multi-tile grid (3 row tiles x 2 column tiles), padding on both axes ----
    in_f2, out_f2, batch2, seq2 = 48, 160, 2, 36            # m = 72 -> padded to 96
    a2 = 0.5 + jax.random.uniform(k_a2, (out_f2, 1), jnp.float32)
    b2 = 0.1 * jax.random.normal(k_b2, (out_f2, 1), jnp.float32)
    bias2 = 0.5 * jax.random.normal(k_bias2, (out_f2,), jnp.float32)
    x2 = jax.random.normal(k_x2, (batch2, seq2, in_f2), jnp.float32)

    y2 = jax.block_until_ready(linear_cwt(x2, a2, b2, bias2, tile_m=32, tile_n=128))
    y2_ref = linear_cwt_reference(x2, a2, b2, bias2)
    assert y2.shape == (batch2, seq2, out_f2), y2.shape
    assert jnp.allclose(y2, y2_ref, atol=1e-4, rtol=1e-4), "case 2 mismatch vs reference"

    # --- Case 3: default tiles (tile_n=256 path), out_f padded 500 -> 512, 2 column tiles -
    in_f3, out_f3, batch3, seq3 = 64, 500, 4, 40            # m = 160
    a3 = 0.5 + jax.random.uniform(k_a3, (out_f3, 1), jnp.float32)
    b3 = 0.1 * jax.random.normal(k_b3, (out_f3, 1), jnp.float32)
    bias3 = 0.5 * jax.random.normal(k_bias3, (out_f3,), jnp.float32)
    x3 = jax.random.normal(k_x3, (batch3, seq3, in_f3), jnp.float32)

    y3 = jax.block_until_ready(linear_cwt(x3, a3, b3, bias3))
    y3_ref = linear_cwt_reference(x3, a3, b3, bias3)
    assert y3.shape == (batch3, seq3, out_f3), y3.shape
    assert jnp.allclose(y3, y3_ref, atol=1e-4, rtol=1e-4), "case 3 mismatch vs reference"

    print("KERNEL_OK")
</pallas_src>

<mosaic_0001>
module attributes {stable_mosaic.version = 11 : i64} {
  func.func @linear_cwt_kernel(%arg0: i32, %arg1: i32, %arg2: memref<16x32xf32, #tpu.memory_space<vmem>>, %arg3: memref<32x8xf32, #tpu.memory_space<vmem>>, %arg4: memref<8x128xf32, #tpu.memory_space<vmem>>, %arg5: memref<1x128xf32, #tpu.memory_space<vmem>>, %arg6: memref<16x128xf32, #tpu.memory_space<vmem>>) attributes {dimension_semantics = [#tpu.dimension_semantics<parallel>, #tpu.dimension_semantics<parallel>], iteration_bounds = array<i64: 1, 1>, scalar_prefetch = 0 : i64, scratch_operands = 0 : i64, tpu.core_type = #tpu.core_type<tc>, window_params = [{transform_indices = @transform_0, window_bounds = array<i64: 16, 32>}, {pipeline_mode = #tpu.pipeline_mode<synchronous>, transform_indices = @transform_1, window_bounds = array<i64: 32, 8>}, {transform_indices = @transform_2, window_bounds = array<i64: 8, 128>}, {transform_indices = @transform_3, window_bounds = array<i64: 1, 128>}, {transform_indices = @transform_4, window_bounds = array<i64: 16, 128>}]} {
    %c0 = arith.constant 0 : index
    %c0_0 = arith.constant 0 : index
    %0 = vector.load %arg2[%c0, %c0_0] : memref<16x32xf32, #tpu.memory_space<vmem>>, vector<16x32xf32>
    %c0_1 = arith.constant 0 : index
    %c0_2 = arith.constant 0 : index
    %1 = vector.load %arg3[%c0_1, %c0_2] : memref<32x8xf32, #tpu.memory_space<vmem>>, vector<32x8xf32>
    %cst = arith.constant dense<0.000000e+00> : vector<16x8xf32>
    %2 = tpu.matmul %0, %1, %cst {dimension_numbers = #tpu.dot_dimension_numbers<[1], [0], [0], [1], [0, 0, 1, 1], [], []>} : vector<16x32xf32>, vector<32x8xf32>, vector<16x8xf32> -> vector<16x8xf32>
    %c0_3 = arith.constant 0 : index
    %c0_4 = arith.constant 0 : index
    %3 = vector.load %arg4[%c0_3, %c0_4] : memref<8x128xf32, #tpu.memory_space<vmem>>, vector<8x128xf32>
    %cst_5 = arith.constant dense<0.000000e+00> : vector<16x128xf32>
    %4 = tpu.matmul %2, %3, %cst_5 {dimension_numbers = #tpu.dot_dimension_numbers<[1], [0], [0], [1], [0, 0, 1, 1], [], []>} : vector<16x8xf32>, vector<8x128xf32>, vector<16x128xf32> -> vector<16x128xf32>
    %c0_6 = arith.constant 0 : index
    %c0_7 = arith.constant 0 : index
    %5 = vector.load %arg5[%c0_6, %c0_7] : memref<1x128xf32, #tpu.memory_space<vmem>>, vector<1x128xf32>
    %6 = vector.broadcast %5 : vector<1x128xf32> to vector<16x128xf32>
    %7 = arith.addf %4, %6 : vector<16x128xf32>
    %c0_8 = arith.constant 0 : index
    %c0_9 = arith.constant 0 : index
    %8 = vector.load %arg6[%c0_8, %c0_9] : memref<16x128xf32, #tpu.memory_space<vmem>>, vector<16x128xf32>
    tpu.vector_store %arg6[%c0_8, %c0_9], %7 {strides = array<i32>} : memref<16x128xf32, #tpu.memory_space<vmem>>, vector<16x128xf32>,
    return
  }
  func.func @transform_0(%arg0: i32, %arg1: i32) -> (i32, i32) {
    %c0_i32 = arith.constant 0 : i32
    %c0_i32_0 = arith.constant 0 : i32
    return %arg0, %c0_i32 : i32, i32
  }
  func.func @transform_1(%arg0: i32, %arg1: i32) -> (i32, i32) {
    %c0_i32 = arith.constant 0 : i32
    %c0_i32_0 = arith.constant 0 : i32
    %c0_i32_1 = arith.constant 0 : i32
    return %c0_i32, %c0_i32_0 : i32, i32
  }
  func.func @transform_2(%arg0: i32, %arg1: i32) -> (i32, i32) {
    %c0_i32 = arith.constant 0 : i32
    %c0_i32_0 = arith.constant 0 : i32
    return %c0_i32, %arg1 : i32, i32
  }
  func.func @transform_3(%arg0: i32, %arg1: i32) -> (i32, i32) {
    %c0_i32 = arith.constant 0 : i32
    %c0_i32_0 = arith.constant 0 : i32
    return %c0_i32, %arg1 : i32, i32
  }
  func.func @transform_4(%arg0: i32, %arg1: i32) -> (i32, i32) {
    %c0_i32 = arith.constant 0 : i32
    return %arg0, %arg1 : i32, i32
  }
}

</mosaic_0001>

<bundles_post_ra>
// kernel: tpu_custom_call.1
= control target key start
LH: loop header
LB: loop body
LE: loop exit
PB: predicated region body
PF: predicated region fallthrough
CT: control target
= control target key end

     0   :  { %vm24_vm0 = vcmask 261120   ;;  %s343_s0 = inlined_call_operand.vmem [shape: f32[16,32], index: 0, kind: input, shape index: {}]   ;;  %s344_s1 = inlined_call_operand.vmem [shape: f32[32,8], index: 1, kind: input, shape index: {}]   ;;  %s345_s2 = inlined_call_operand.vmem [shape: f32[8,128], index: 2, kind: input, shape index: {}]   ;;  %s346_s3 = inlined_call_operand.vmem [shape: f32[1,128], index: 3, kind: input, shape index: {}]   ;;  %s347_s4 = inlined_call_operand.hbm [shape: f32[16,128], index: 4, kind: output, shape index: {}]  }
   0x1   :  { %v20_v0 = vld [vmem:[%s344_s1] sm:$0xff]  ;;  %v21_v1 = vld [vmem:[%s344_s1 + $0x8] sm:$0xff]  ;;  %v22_v2 = vld [vmem:[%s344_s1 + $0x10] sm:$0xff] }
   0x2   :  { %v244_v3 = vpack.c.bf16 %v21_v1, %v20_v0  ;;  %v23_v4 = vld [vmem:[%s344_s1 + $0x18] sm:$0xff]  ;;  %v18_v5 = vld [vmem:[%s343_s0] sm:$0xff] }
   0x3   :  { %v248_v6 = vpack.c.bf16 %v23_v4, %v22_v2  ;;  %236 = vmatprep.mubr.msk.f32.mxu0 %vm24_vm0, %v18_v5 }
   0x4   :  { %9 = vsyncpa [#allocation3], 0  ;;  %245 = vmatprep.subr.bf16.mxu0 %v244_v3  ;;  %v19_v7 = vld [vmem:[%s343_s0 + $0x8] sm:$0xff]  ;;  %v106_v8 = vld [vmem:[%s345_s2] sm:$0xff]  ;;  %vm114_vm1 = vcmask 64512   ;;  %s279_s30 = smov [#allocation2]  }
   0x5   :  { %247 = vmatpush3.bf16.msra.mxu0 %v244_v3  ;;  %239 = vmatprep.subr.mxu1 %v106_v8  ;;  %v216_v11 = vld [vmem:[%s346_s3] ss:$0 sm:$0xff]  ;;  %s203_s5 = sshll.u32 %s279_s30, 4  ;;  %s204_s5 = int_to_ptr.vmem [resolvable:$true] %s203_s5 }
   0x6   :  { %249 = vmatprep.subr.bf16.mxu0 %v248_v6  ;;  %240 = vmatpush3.msra.mxu1 %v106_v8  ;;  %s255_s0 = scalar_lea.vmem %s204_s5, 256  ;;  %p260_p1 = scmp.lt.s32.totalorder %s204_s5, %s204_s5 }
   0x7   :  { %p256_p0 = scmp.ne.s32.totalorder %s204_s5, %s255_s0  ;;  %p261_p2 = scmp.lt.s32.totalorder %s255_s0, %s255_s0 }
   0x9   :  { %251 = vmatpush3.bf16.msra.mxu0 %v248_v6  ;;  %p262_p3 = por %p261_p2, %p260_p1 }
   0xb   :  { %p263_p4 = pnand %p262_p3, %p256_p0 }
   0xc   :  { %237 = vmatmul.mubr.msk.f32.vlgmr.msra.gmra.mrb[0].mxu0 %vm24_vm0, %v19_v7 }
  0xdf   :  { %v238_v9 = vpop.f32.mrb[0].mxu0 }
  0xe0   :  { %v97_v10 = vpop.f32.mrb[1].mxu0 }
  0xe1   :  { %241 = vmatprep.mubr.msk.f32.mxu1 %vm114_vm1, %v97_v10 }
  0xe2   :  { %242 = vmatmul.mubr.msk.f32.vlgmr.msra.gmra.mrb[0].mxu1 %vm114_vm1, %v238_v9 }
 0x1b5   :  { %v243_v12 = vpop.f32.mrb[0].mxu1 }
 0x1b6   :  { %v193_v13 = vadd.f32 %v243_v12, %v216_v11  ;;  %v187_v14 = vpop.f32.mrb[1].mxu1 }
 0x1b7   :  { %v188_v15 = vadd.f32 %v216_v11, %v187_v14 }
 0x1b8   :  { %197 = vst [vmem:[#allocation2 + $0x8] sm:$0xff] %v193_v13 }
 0x1b9   :  { %196 = vst [vmem:[#allocation2] sm:$0xff] %v188_v15 }
 0x1ba   :  { %266 = shalt.err (!%p263_p4)
}
 0x1bb   :  { %s267_s3 = scalar_lea.hbm %s347_s4, 256 }
 0x1bc   :  { %p268_p5 = scmp.ne.s32.totalorder %s347_s4, %s267_s3  ;;  %p271_p6 = scmp.lt.u32.totalorder %s267_s3, %s347_s4 }
 0x1be   :  { %p273_p7 = pnand %p271_p6, %p268_p5 }
 0x1c0   :  { %276 = shalt.err (!%p273_p7)
}
 0x1c1   :  { %s280_s11 = smov 128   ;;  %s281_s12 = smov 8  }
 0x1c2   :  { %209 = dma.vmem_to_hbm [thread:$0]  %s204_s5, 256, %s347_s4, [#allocation3], %s280_s11, %s280_s11, %s281_s12  }
 0x1c3   :  { %277 = dma.done.wait [#allocation3], 256  }
 0x1c4   :  { %278 = vsyncadd [#allocation3], 4294967040 }
 0x1c5   :  { %213 = vsyncpa [#allocation3], 1 }

</bundles_post_ra>
